<compile_context>
chip_gen: v7x
topology: tpu7x:2x2x1
jax: 0.10.0
libtpu: 0.0.40
codegen_flags: <defaults>
</compile_context>

<pallas_src>
import functools
from math import sqrt

import jax
import jax.numpy as jnp
from jax.experimental import pallas as pl
from jax.experimental.pallas import tpu as pltpu

_INV_SQRT2 = 0.7071067811865476


def _round_up(a: int, b: int) -> int:
    return pl.cdiv(a, b) * b


@functools.lru_cache(maxsize=1)
def _vmem_capacity_bytes() -> int:
    """Physical VMEM per core; conservative (v7x-sized) fallback if the query fails."""
    try:
        return int(pltpu.get_tpu_info().vmem_capacity_bytes)
    except Exception:
        return 64 * 1024 * 1024


def _select_geometry(n, dim, hidden, in_bytes, out_bytes, tm_req, th_req):
    """Pick (tm, th, dim_p, hidden_p, vmem_limit) from shapes + chip VMEM size."""
    vmem_phys = _vmem_capacity_bytes()
    small_vmem = vmem_phys < (96 << 20)            # v7x-class: 64 MiB VMEM, 2 TensorCores
    vmem_limit = min(int(vmem_phys * 0.85), 112 << 20)
    budget = int(vmem_limit * 0.9)

    dim_p = _round_up(dim, 128)                    # lane-dense output / aligned K
    hidden_p = _round_up(hidden, 128)

    # Hidden reduction tile (multiple of 128).
    th = 512 if th_req is None else th_req
    th = min(max(128, _round_up(th, 128)), hidden_p)
    hidden_p = _round_up(hidden_p, th)

    # Token tile: as large as VMEM allows (amortizes full-weight re-streaming per tile).
    if tm_req is not None:
        tm = max(8, _round_up(tm_req, 8))
    else:
        tm = 512 if small_vmem else 1024
    tm = min(tm, _round_up(n, 8))

    # Dual-TC chips: make sure the parallel (token) axis has >= 2 tiles when possible.
    if small_vmem and _round_up(n, 8) // tm < 2:
        half = _round_up(pl.cdiv(n, 2), 8)
        if 8 <= half < tm:
            tm = half

    def vmem_est(tm_, th_):
        return (2 * tm_ * dim_p * in_bytes           # x tile (double-buffered)
                + 2 * dim_p * th_ * in_bytes         # w1 tile
                + 2 * th_ * dim_p * in_bytes         # w2 tile
                + 2 * (th_ + dim_p) * in_bytes       # biases
                + tm_ * dim_p * 4                    # f32 accumulator scratch
                + 2 * tm_ * dim_p * out_bytes)       # output tile

    while vmem_est(tm, th) > budget and tm > 128:
        tm = max(128, _round_up(tm // 2, 8))
    while vmem_est(tm, th) > budget and th > 128:
        th = max(128, _round_up(th // 2, 128))
        hidden_p = _round_up(_round_up(hidden, 128), th)

    return tm, th, dim_p, hidden_p, vmem_limit


def ffn_kernel(x_ref, w1_ref, b1_ref, w2_ref, b2_ref, o_ref, acc_ref):
    # x_ref:  (tm, dim_p)    token tile, weight dtype (resident across the hidden axis)
    # w1_ref: (dim_p, th)    first-linear weight tile (streamed over hidden)
    # b1_ref: (1, th)        first-linear bias tile
    # w2_ref: (th, dim_p)    second-linear weight tile (streamed over hidden)
    # b2_ref: (1, dim_p)     second-linear bias (resident)
    # o_ref:  (tm, dim_p)    output tile (written on last hidden step)
    # acc_ref:(tm, dim_p) f32 accumulator scratch
    h_idx = pl.program_id(1)

    @pl.when(h_idx == 0)
    def _():
        # Fold b2 into the accumulator init (no epilogue add, no zero-fill).
        acc_ref[...] = jnp.broadcast_to(b2_ref[...].astype(jnp.float32), acc_ref.shape)

    x = x_ref[...]
    # Linear 1 (MXU), f32 accumulation, + bias
    h = jnp.dot(x, w1_ref[...], preferred_element_type=jnp.float32) + b1_ref[...]
    # Exact (erf-based) GELU, matching torch.nn.GELU() default
    h = 0.5 * h * (1.0 + jax.lax.erf(h * _INV_SQRT2))
    # Dropout(p=0.0) -> identity
    # Partial Linear 2 (MXU) accumulated over hidden tiles
    acc_ref[...] += jnp.dot(h.astype(w2_ref.dtype), w2_ref[...],
                            preferred_element_type=jnp.float32)
    # Dropout(p=0.0) -> identity

    @pl.when(h_idx == pl.num_programs(1) - 1)
    def _():
        o_ref[...] = acc_ref[...].astype(o_ref.dtype)


@functools.partial(jax.jit, static_argnames=("tm", "th"))
def feed_forward(x, w1, b1, w2, b2, *, tm=None, th=None):
    """x: (..., dim). Returns same shape. Weights stored as (in, out)."""
    orig_shape = x.shape
    dim = orig_shape[-1]
    hidden = w1.shape[1]

    x2d = x.reshape(-1, dim)
    n = x2d.shape[0]

    in_dtype = w1.dtype
    in_bytes = jnp.dtype(in_dtype).itemsize
    out_bytes = jnp.dtype(x.dtype).itemsize

    tm_eff, th_eff, dim_p, hidden_p, vmem_limit = _select_geometry(
        n, dim, hidden, in_bytes, out_bytes, tm, th)

    n_p = _round_up(n, tm_eff)

    def pad2(a, rows, cols):
        pr, pc = rows - a.shape[0], cols - a.shape[1]
        if pr == 0 and pc == 0:          # static check: aligned inputs pay nothing
            return a
        return jnp.pad(a, ((0, pr), (0, pc)))

    # Pre-cast activations to the weight dtype (halves x DMA / VMEM for bf16 weights).
    # Zero padding is exact: padded hidden columns are gelu(0)=0 and hit zero rows of w2;
    # padded dim/token entries are sliced off below.
    xp = pad2(x2d.astype(in_dtype), n_p, dim_p)
    w1p = pad2(w1, dim_p, hidden_p)
    b1p = pad2(b1.reshape(1, -1), 1, hidden_p)
    w2p = pad2(w2, hidden_p, dim_p)
    b2p = pad2(b2.reshape(1, -1), 1, dim_p)

    grid = (n_p // tm_eff, hidden_p // th_eff)

    out = pl.pallas_call(
        ffn_kernel,
        out_shape=jax.ShapeDtypeStruct((n_p, dim_p), x.dtype),
        grid_spec=pltpu.PrefetchScalarGridSpec(
            num_scalar_prefetch=0,
            grid=grid,
            in_specs=[
                pl.BlockSpec((tm_eff, dim_p), lambda i, h: (i, 0)),   # x tile (resident over h)
                pl.BlockSpec((dim_p, th_eff), lambda i, h: (0, h)),   # w1 hidden tile
                pl.BlockSpec((1, th_eff), lambda i, h: (0, h)),       # b1 hidden tile
                pl.BlockSpec((th_eff, dim_p), lambda i, h: (h, 0)),   # w2 hidden tile
                pl.BlockSpec((1, dim_p), lambda i, h: (0, 0)),        # b2 (resident)
            ],
            out_specs=pl.BlockSpec((tm_eff, dim_p), lambda i, h: (i, 0)),
            scratch_shapes=[pltpu.VMEM((tm_eff, dim_p), jnp.float32)],
        ),
        compiler_params=pltpu.CompilerParams(
            dimension_semantics=("parallel", "arbitrary"),
            vmem_limit_bytes=vmem_limit,
        ),
    )(xp, w1p, b1p, w2p, b2p)

    return out[:n, :dim].reshape(orig_shape)


def init_params(key, dim, hidden_dim, dtype=jnp.float32):
    """Deterministic init mirroring nn.Linear default (uniform +- 1/sqrt(fan_in)).
    Weights are stored as (in_features, out_features)."""
    k1, k2, k3, k4 = jax.random.split(key, 4)
    bound1 = 1.0 / sqrt(dim)
    bound2 = 1.0 / sqrt(hidden_dim)
    w1 = jax.random.uniform(k1, (dim, hidden_dim), dtype, -bound1, bound1)
    b1 = jax.random.uniform(k2, (1, hidden_dim), dtype, -bound1, bound1)
    w2 = jax.random.uniform(k3, (hidden_dim, dim), dtype, -bound2, bound2)
    b2 = jax.random.uniform(k4, (1, dim), dtype, -bound2, bound2)
    return w1, b1, w2, b2


def feed_forward_ref(x, w1, b1, w2, b2):
    """Pure-JAX reference of the PyTorch forward (GELU exact, dropout p=0)."""
    h = x @ w1 + b1[0]
    h = 0.5 * h * (1.0 + jax.lax.erf(h * _INV_SQRT2))
    return h @ w2 + b2[0]


if __name__ == "__main__":
    key = jax.random.PRNGKey(0)
    kx, kp = jax.random.split(key)

    batch, seq, dim, hidden_dim = 2, 8, 32, 64
    x = jax.random.normal(kx, (batch, seq, dim), jnp.float32)
    w1, b1, w2, b2 = init_params(kp, dim, hidden_dim)

    out = feed_forward(x, w1, b1, w2, b2)
    out = jax.block_until_ready(out)

    ref = feed_forward_ref(x, w1, b1, w2, b2)
    assert out.shape == x.shape
    assert jnp.allclose(out, ref, atol=1e-5, rtol=1e-5), "mismatch vs reference"

    print("KERNEL_OK")
</pallas_src>

<mosaic_0001>
module attributes {stable_mosaic.version = 11 : i64} {
  func.func @ffn_kernel(%arg0: i32, %arg1: i32, %arg2: memref<8x128xf32, #tpu.memory_space<vmem>>, %arg3: memref<128x128xf32, #tpu.memory_space<vmem>>, %arg4: memref<1x128xf32, #tpu.memory_space<vmem>>, %arg5: memref<128x128xf32, #tpu.memory_space<vmem>>, %arg6: memref<1x128xf32, #tpu.memory_space<vmem>>, %arg7: memref<8x128xf32, #tpu.memory_space<vmem>>, %arg8: memref<8x128xf32, #tpu.memory_space<vmem>>) attributes {dimension_semantics = [#tpu.dimension_semantics<parallel>, #tpu.dimension_semantics<arbitrary>], iteration_bounds = array<i64: 2, 1>, scalar_prefetch = 0 : i64, scratch_operands = 1 : i64, tpu.core_type = #tpu.core_type<tc>, window_params = [{transform_indices = @transform_0, window_bounds = array<i64: 8, 128>}, {transform_indices = @transform_1, window_bounds = array<i64: 128, 128>}, {transform_indices = @transform_2, window_bounds = array<i64: 1, 128>}, {transform_indices = @transform_3, window_bounds = array<i64: 128, 128>}, {pipeline_mode = #tpu.pipeline_mode<synchronous>, transform_indices = @transform_4, window_bounds = array<i64: 1, 128>}, {transform_indices = @transform_5, window_bounds = array<i64: 8, 128>}]} {
    %c0_i32 = arith.constant 0 : i32
    %0 = arith.cmpi eq, %arg1, %c0_i32 : i32
    %1 = arith.extui %0 : i1 to i32
    %c0_i32_0 = arith.constant 0 : i32
    %2 = arith.cmpi ne, %1, %c0_i32_0 : i32
    scf.if %2 {
      %c0_18 = arith.constant 0 : index
      %c0_19 = arith.constant 0 : index
      %25 = vector.load %arg6[%c0_18, %c0_19] : memref<1x128xf32, #tpu.memory_space<vmem>>, vector<1x128xf32>
      %26 = vector.shape_cast %25 : vector<1x128xf32> to vector<1x128xf32>
      %27 = vector.broadcast %26 : vector<1x128xf32> to vector<8x128xf32>
      %c0_20 = arith.constant 0 : index
      %c0_21 = arith.constant 0 : index
      %28 = vector.load %arg8[%c0_20, %c0_21] : memref<8x128xf32, #tpu.memory_space<vmem>>, vector<8x128xf32>
      tpu.vector_store %arg8[%c0_20, %c0_21], %27 {strides = array<i32>} : memref<8x128xf32, #tpu.memory_space<vmem>>, vector<8x128xf32>,
    } else {
    }
    %c0 = arith.constant 0 : index
    %c0_1 = arith.constant 0 : index
    %3 = vector.load %arg2[%c0, %c0_1] : memref<8x128xf32, #tpu.memory_space<vmem>>, vector<8x128xf32>
    %c0_2 = arith.constant 0 : index
    %c0_3 = arith.constant 0 : index
    %4 = vector.load %arg3[%c0_2, %c0_3] : memref<128x128xf32, #tpu.memory_space<vmem>>, vector<128x128xf32>
    %cst = arith.constant dense<0.000000e+00> : vector<8x128xf32>
    %5 = tpu.matmul %3, %4, %cst {dimension_numbers = #tpu.dot_dimension_numbers<[1], [0], [0], [1], [0, 0, 1, 1], [], []>} : vector<8x128xf32>, vector<128x128xf32>, vector<8x128xf32> -> vector<8x128xf32>
    %c0_4 = arith.constant 0 : index
    %c0_5 = arith.constant 0 : index
    %6 = vector.load %arg4[%c0_4, %c0_5] : memref<1x128xf32, #tpu.memory_space<vmem>>, vector<1x128xf32>
    %7 = vector.broadcast %6 : vector<1x128xf32> to vector<8x128xf32>
    %8 = arith.addf %5, %7 : vector<8x128xf32>
    %cst_6 = arith.constant 5.000000e-01 : f32
    %9 = vector.broadcast %cst_6 : f32 to vector<8x128xf32>
    %10 = arith.mulf %9, %8 : vector<8x128xf32>
    %cst_7 = arith.constant 0.707106769 : f32
    %11 = vector.broadcast %cst_7 : f32 to vector<8x128xf32>
    %12 = arith.mulf %8, %11 : vector<8x128xf32>
    %13 = math.erf %12 : vector<8x128xf32>
    %cst_8 = arith.constant 1.000000e+00 : f32
    %14 = vector.broadcast %cst_8 : f32 to vector<8x128xf32>
    %15 = arith.addf %14, %13 : vector<8x128xf32>
    %16 = arith.mulf %10, %15 : vector<8x128xf32>
    %c0_9 = arith.constant 0 : index
    %c0_10 = arith.constant 0 : index
    %17 = vector.load %arg8[%c0_9, %c0_10] : memref<8x128xf32, #tpu.memory_space<vmem>>, vector<8x128xf32>
    %c0_11 = arith.constant 0 : index
    %c0_12 = arith.constant 0 : index
    %18 = vector.load %arg5[%c0_11, %c0_12] : memref<128x128xf32, #tpu.memory_space<vmem>>, vector<128x128xf32>
    %cst_13 = arith.constant dense<0.000000e+00> : vector<8x128xf32>
    %19 = tpu.matmul %16, %18, %cst_13 {dimension_numbers = #tpu.dot_dimension_numbers<[1], [0], [0], [1], [0, 0, 1, 1], [], []>} : vector<8x128xf32>, vector<128x128xf32>, vector<8x128xf32> -> vector<8x128xf32>
    %20 = arith.addf %17, %19 : vector<8x128xf32>
    %c0_14 = arith.constant 0 : index
    %c0_15 = arith.constant 0 : index
    %21 = vector.load %arg8[%c0_14, %c0_15] : memref<8x128xf32, #tpu.memory_space<vmem>>, vector<8x128xf32>
    tpu.vector_store %arg8[%c0_14, %c0_15], %20 {strides = array<i32>} : memref<8x128xf32, #tpu.memory_space<vmem>>, vector<8x128xf32>,
    %c0_i32_16 = arith.constant 0 : i32
    %22 = arith.cmpi eq, %arg1, %c0_i32_16 : i32
    %23 = arith.extui %22 : i1 to i32
    %c0_i32_17 = arith.constant 0 : i32
    %24 = arith.cmpi ne, %23, %c0_i32_17 : i32
    scf.if %24 {
      %c0_18 = arith.constant 0 : index
      %c0_19 = arith.constant 0 : index
      %25 = vector.load %arg8[%c0_18, %c0_19] : memref<8x128xf32, #tpu.memory_space<vmem>>, vector<8x128xf32>
      %c0_20 = arith.constant 0 : index
      %c0_21 = arith.constant 0 : index
      %26 = vector.load %arg7[%c0_20, %c0_21] : memref<8x128xf32, #tpu.memory_space<vmem>>, vector<8x128xf32>
      tpu.vector_store %arg7[%c0_20, %c0_21], %25 {strides = array<i32>} : memref<8x128xf32, #tpu.memory_space<vmem>>, vector<8x128xf32>,
    } else {
    }
    return
  }
  func.func @transform_0(%arg0: i32, %arg1: i32) -> (i32, i32) {
    %c0_i32 = arith.constant 0 : i32
    %c0_i32_0 = arith.constant 0 : i32
    return %arg0, %c0_i32 : i32, i32
  }
  func.func @transform_1(%arg0: i32, %arg1: i32) -> (i32, i32) {
    %c0_i32 = arith.constant 0 : i32
    %c0_i32_0 = arith.constant 0 : i32
    return %c0_i32, %arg1 : i32, i32
  }
  func.func @transform_2(%arg0: i32, %arg1: i32) -> (i32, i32) {
    %c0_i32 = arith.constant 0 : i32
    %c0_i32_0 = arith.constant 0 : i32
    return %c0_i32, %arg1 : i32, i32
  }
  func.func @transform_3(%arg0: i32, %arg1: i32) -> (i32, i32) {
    %c0_i32 = arith.constant 0 : i32
    %c0_i32_0 = arith.constant 0 : i32
    return %arg1, %c0_i32 : i32, i32
  }
  func.func @transform_4(%arg0: i32, %arg1: i32) -> (i32, i32) {
    %c0_i32 = arith.constant 0 : i32
    %c0_i32_0 = arith.constant 0 : i32
    %c0_i32_1 = arith.constant 0 : i32
    return %c0_i32, %c0_i32_0 : i32, i32
  }
  func.func @transform_5(%arg0: i32, %arg1: i32) -> (i32, i32) {
    %c0_i32 = arith.constant 0 : i32
    %c0_i32_0 = arith.constant 0 : i32
    return %arg0, %c0_i32 : i32, i32
  }
}

</mosaic_0001>

<bundles_post_ra>
// kernel: feed_forward.1
= control target key start
LH: loop header
LB: loop body
LE: loop exit
PB: predicated region body
PF: predicated region fallthrough
CT: control target
= control target key end

     0   :  { %s846_s18 = smov 0   ;;  %s848_s19 = smov 0   ;;  %s1008_s0 = inlined_call_operand.vmem [shape: f32[16,128], index: 0, kind: input, shape index: {}]   ;;  %s1009_s1 = inlined_call_operand.vmem [shape: f32[128,128], index: 1, kind: input, shape index: {}]   ;;  %s1010_s2 = inlined_call_operand.vmem [shape: f32[1,128], index: 2, kind: input, shape index: {}]   ;;  %s1011_s3 = inlined_call_operand.vmem [shape: f32[128,128], index: 3, kind: input, shape index: {}]   ;;  %s1012_s4 = inlined_call_operand.vmem [shape: f32[1,128], index: 4, kind: input, shape index: {}]   ;;  %s1013_s5 = inlined_call_operand.vmem [shape: f32[16,128], index: 5, kind: output, shape index: {}]  }
   0x1   :  { %s850_s20 = smov 0  }
   0x2 LB: > { %s27_s21 = sadd.s32 1, %s807_s19  ;;  %p601_p0 = scmp.ge.s32.totalorder %s811_s20, 1  ;;  %s811_s20 = sphi %s850_s20, %s15_s20   ;;  %s807_s19 = sphi %s848_s19, %s1015_s19   ;;  %s803_s18 = sphi %s846_s18, %s1014_s18  }
   0x3   : > { %p29_p1 = scmp.ge.s32.totalorder %s27_s21, 2  ;;  %p226_p2 = scmp.lt.s32.totalorder %s811_s20, 3 }
   0x5   : > { %s1017_s21 = smov (%p29_p1, %s27_s21), 0  ;;  %p227_p3 = pnand %p601_p0, %p226_p2 }
   0x6   : > { %v298_v0 = vld [vmem:[%s1009_s1] sm:$0xff] (!%p227_p3)  ;;  %v299_v1 = vld [vmem:[%s1009_s1 + $0x8] sm:$0xff] (!%p227_p3)  ;;  %v300_v2 = vld [vmem:[%s1009_s1 + $0x10] sm:$0xff] (!%p227_p3)  ;;  %v813_v3 = vmov (!%p227_p3), 0.0|0.0   ;;  %vm814_vm0 = vmmov (!%p227_p3), 0   ;;  %v815_v6 = vmov (!%p227_p3), 0.0  }
   0x7   : > { %230 = sbr.rel (%p227_p3) target bundleno = 486 (0x1e6), region = 40  ;;  %712 = vmatprep.subr.bf16.mxu0 (!%p227_p3), %v813_v3  ;;  %v713_v4 = vpack.c.bf16 (!%p227_p3), %v299_v1, %v298_v0  ;;  %v301_v5 = vld [vmem:[%s1009_s1 + $0x18] sm:$0xff] (!%p227_p3)  ;;  %674 = vmatprep.mubr.msk.f32.mxu0 (!%p227_p3), %vm814_vm0, %v815_v6  ;;  %v302_v8 = vld [vmem:[%s1009_s1 + $0x20] sm:$0xff] (!%p227_p3)  ;;  %v303_v9 = vld [vmem:[%s1009_s1 + $0x28] sm:$0xff] (!%p227_p3)  ;;  %p264_p4 = scmp.lt.s32.totalorder (!%p227_p3), %s803_s18, 1 }
   0x8   : > { %736 = vmatprep.subr.bf16.mxu1 (!%p227_p3), %v813_v3  ;;  %709 = vmatprep.mubr.msk.f32.mxu1 (!%p227_p3), %vm814_vm0, %v815_v6  ;;  %v716_v7 = vpack.c.bf16 (!%p227_p3), %v301_v5, %v300_v2  ;;  %v397_v10 = vld [vmem:[%s1011_s3] sm:$0xff] (!%p227_p3)  ;;  %v398_v11 = vld [vmem:[%s1011_s3 + $0x8] sm:$0xff] (!%p227_p3)  ;;  %v399_v13 = vld [vmem:[%s1011_s3 + $0x10] sm:$0xff] (!%p227_p3)  ;;  %v719_v15 = vpack.c.bf16 (!%p227_p3), %v303_v9, %v302_v8 }
   0x9   : > { %714 = vmatpush3.bf16.msra.mxu0 (!%p227_p3), %v713_v4  ;;  %v737_v12 = vpack.c.bf16 (!%p227_p3), %v398_v11, %v397_v10  ;;  %v400_v14 = vld [vmem:[%s1011_s3 + $0x18] sm:$0xff] (!%p227_p3)  ;;  %v304_v16 = vld [vmem:[%s1009_s1 + $0x30] sm:$0xff] (!%p227_p3)  ;;  %v401_v19 = vld [vmem:[%s1011_s3 + $0x20] sm:$0xff] (!%p227_p3) }
   0xa   : > { %715 = vmatprep.subr.bf16.mxu0 (!%p227_p3), %v813_v3  ;;  %v305_v17 = vld [vmem:[%s1009_s1 + $0x38] sm:$0xff] (!%p227_p3)  ;;  %v740_v18 = vpack.c.bf16 (!%p227_p3), %v400_v14, %v399_v13  ;;  %v402_v20 = vld [vmem:[%s1011_s3 + $0x28] sm:$0xff] (!%p227_p3)  ;;  %v306_v22 = vld [vmem:[%s1009_s1 + $0x40] sm:$0xff] (!%p227_p3) }
   0xb   : > { %738 = vmatpush3.bf16.msra.mxu1 (!%p227_p3), %v737_v12  ;;  %v722_v21 = vpack.c.bf16 (!%p227_p3), %v305_v17, %v304_v16  ;;  %v307_v23 = vld [vmem:[%s1009_s1 + $0x48] sm:$0xff] (!%p227_p3)  ;;  %v743_v24 = vpack.c.bf16 (!%p227_p3), %v402_v20, %v401_v19  ;;  %v308_v26 = vld [vmem:[%s1009_s1 + $0x50] sm:$0xff] (!%p227_p3)  ;;  %v309_v27 = vld [vmem:[%s1009_s1 + $0x58] sm:$0xff] (!%p227_p3) }
   0xc   : > { %739 = vmatprep.subr.bf16.mxu1 (!%p227_p3), %v813_v3  ;;  %v725_v25 = vpack.c.bf16 (!%p227_p3), %v307_v23, %v306_v22  ;;  %v728_v28 = vpack.c.bf16 (!%p227_p3), %v309_v27, %v308_v26  ;;  %v310_v29 = vld [vmem:[%s1009_s1 + $0x60] sm:$0xff] (!%p227_p3)  ;;  %v311_v30 = vld [vmem:[%s1009_s1 + $0x68] sm:$0xff] (!%p227_p3)  ;;  %v312_v32 = vld [vmem:[%s1009_s1 + $0x70] sm:$0xff] (!%p227_p3) }
   0xd   : > { %717 = vmatpush3.bf16.msra.mxu0 (!%p227_p3), %v716_v7  ;;  %v731_v31 = vpack.c.bf16 (!%p227_p3), %v311_v30, %v310_v29  ;;  %v313_v33 = vld [vmem:[%s1009_s1 + $0x78] sm:$0xff] (!%p227_p3)  ;;  %v403_v36 = vld [vmem:[%s1011_s3 + $0x30] sm:$0xff] (!%p227_p3)  ;;  %v405_v39 = vld [vmem:[%s1011_s3 + $0x40] sm:$0xff] (!%p227_p3) }
   0xe   : > { %718 = vmatprep.subr.bf16.mxu0 %v813_v3  ;;  %s1019_s18 = smov (!%p264_p4, %s803_s18), 1  ;;  %v734_v34 = vpack.c.bf16 %v313_v33, %v312_v32  ;;  %v404_v37 = vld [vmem:[%s1011_s3 + $0x38] sm:$0xff]  ;;  %v406_v40 = vld [vmem:[%s1011_s3 + $0x48] sm:$0xff]  ;;  %v407_v42 = vld [vmem:[%s1011_s3 + $0x50] sm:$0xff] }
   0xf   : > { %741 = vmatpush3.bf16.msra.mxu1 %v740_v18  ;;  %s602_s24 = sshll.u32 %s1019_s18, 3  ;;  %v746_v38 = vpack.c.bf16 %v404_v37, %v403_v36  ;;  %v749_v41 = vpack.c.bf16 %v406_v40, %v405_v39  ;;  %v408_v43 = vld [vmem:[%s1011_s3 + $0x58] sm:$0xff]  ;;  %v409_v45 = vld [vmem:[%s1011_s3 + $0x60] sm:$0xff]  ;;  %v410_v46 = vld [vmem:[%s1011_s3 + $0x68] sm:$0xff] }
  0x10   : > { %742 = vmatprep.subr.bf16.mxu1 %v813_v3  ;;  %s267_s27 = scalar_lea.vmem %s1008_s0, %s602_s24  ;;  %v752_v44 = vpack.c.bf16 %v408_v43, %v407_v42  ;;  %v755_v47 = vpack.c.bf16 %v410_v46, %v409_v45  ;;  %v411_v48 = vld [vmem:[%s1011_s3 + $0x70] sm:$0xff]  ;;  %v412_v49 = vld [vmem:[%s1011_s3 + $0x78] sm:$0xff]  ;;  %v605_v51 = vld [vmem:[%s1010_s2] ss:$0 sm:$0xff]  ;;  %s284_s9 = scalar_lea.vmem %s1013_s5, %s602_s24 }
  0x11   : > { %720 = vmatpush3.bf16.msra.mxu0 %v719_v15  ;;  %v297_v35 = vld [vmem:[%s267_s27] sm:$0xff]  ;;  %v758_v50 = vpack.c.bf16 %v412_v49, %v411_v48 }
  0x12   : > { %721 = vmatprep.subr.bf16.mxu0 %v813_v3  ;;  %v604_v60 = vld [vmem:[%s1012_s4] ss:$0 sm:$0xff] }
  0x13   : > { %744 = vmatpush3.bf16.msra.mxu1 %v743_v24 }
  0x14   : > { %745 = vmatprep.subr.bf16.mxu1 %v813_v3 }
  0x15   : > { %723 = vmatpush3.bf16.msra.mxu0 %v722_v21 }
  0x16   : > { %724 = vmatprep.subr.bf16.mxu0 %v813_v3 }
  0x17   : > { %747 = vmatpush3.bf16.msra.mxu1 %v746_v38 }
  0x18   : > { %748 = vmatprep.subr.bf16.mxu1 %v813_v3 }
  0x19   : > { %726 = vmatpush3.bf16.msra.mxu0 %v725_v25 }
  0x1a   : > { %727 = vmatprep.subr.bf16.mxu0 %v813_v3 }
  0x1b   : > { %750 = vmatpush3.bf16.msra.mxu1 %v749_v41 }
  0x1c   : > { %751 = vmatprep.subr.bf16.mxu1 %v813_v3 }
  0x1d   : > { %729 = vmatpush3.bf16.msra.mxu0 %v728_v28 }
  0x1e   : > { %730 = vmatprep.subr.bf16.mxu0 %v813_v3 }
  0x1f   : > { %753 = vmatpush3.bf16.msra.mxu1 %v752_v44 }
  0x20   : > { %754 = vmatprep.subr.bf16.mxu1 %v813_v3 }
  0x21   : > { %732 = vmatpush3.bf16.msra.mxu0 %v731_v31 }
  0x22   : > { %733 = vmatprep.subr.bf16.mxu0 %v813_v3 }
  0x23   : > { %756 = vmatpush3.bf16.msra.mxu1 %v755_v47 }
  0x24   : > { %757 = vmatprep.subr.bf16.mxu1 %v813_v3 }
  0x25   : > { %735 = vmatpush3.bf16.msra.mxu0 %v734_v34 }
  0x27   : > { %759 = vmatpush3.bf16.msra.mxu1 %v758_v50 }
  0x28   : > { %675 = vmatmul.mubr.f32.vlgmr.msra.gmra.mrb[0].mxu0 %v297_v35 }
  0xfb   : > { %v387_v52 = vpop.f32.mrb[0].mxu0 }
  0xfc   : > { %v388_v53 = vadd.f32 %v605_v51, %v387_v52  ;;  %v676_v54 = vpop.f32.mrb[1].mxu0 }
  0xfe   : > { %v392_v55 = vmul.f32 0.70710677, %v388_v53  ;;  %v391_v57 = vmul.f32 0.5, %v388_v53 }
 0x100   : > { %787 = verf.f32 %v392_v55 }
 0x10a   : > { %v788_v56 = vpop.eup %787 }
 0x10b   : > { %v394_v58 = vadd.f32 1.0, %v788_v56 }
 0x10d   : > { %v395_v59 = vmul.f32 %v394_v58, %v391_v57 }
 0x10f   : > { %710 = vmatmul.mubr.f32.vlgmr.msra.gmra.mrb[0].mxu1 %v395_v59 }
 0x1e2   : > { %v479_v61 = vpop.f32.mrb[0].mxu1 }
 0x1e3   : > { %v483_v62 = vadd.f32 %v604_v60, %v479_v61  ;;  %v711_v63 = vpop.f32.mrb[1].mxu1 }
 0x1e5   : > { %489 = vst [vmem:[%s284_s9] sm:$0xff] %v483_v62 }
 0x1e6 PF: > { %s15_s20 = sadd.s32 1, %s811_s20   ;;  %s1014_s18 = smov %s807_s19 }
 0x1e7   : > { %p12_p5 = scmp.ge.s32.totalorder %s15_s20, 4   ;;  %s1015_s19 = smov %s1017_s21 }
 0x1e9   :  { %14 = sbr.rel (!%p12_p5) target bundleno = 2 (0x2), region = 87 }

</bundles_post_ra>
